<compile_context>
chip_gen: v7x
topology: tpu7x:2x2x1
jax: 0.10.0
libtpu: 0.0.40
codegen_flags: <defaults>
</compile_context>

<pallas_src>
import functools

import jax
import jax.numpy as jnp
from jax.experimental import pallas as pl
from jax.experimental.pallas import tpu as pltpu

LANE = 128     # hidden/output feature dims padded to this (lane-dense outputs)
SUBLANE = 8    # f32 sublane width; batch tile is a multiple of this


def _round_up(x, m):
    return ((x + m - 1) // m) * m


# ----------------------------------------------------------------------------
# Fused kernel: whole FCLayers stack on one batch tile.
#   per layer:  h = relu( h @ Wx' + cat @ Wc' + b' )
# Wx'/Wc' carry the folded eval-mode BN scale; b' = bias*scale + shift.
# Intermediate activations never leave VMEM/vregs.
# ----------------------------------------------------------------------------
def _fused_fclayers_kernel(n_layers, x_ref, cat_ref, *rest):
    o_ref = rest[-1]
    w_refs = rest[:-1]                       # [Wx_0, Wc_0, b_0, Wx_1, Wc_1, b_1, ...]
    w_dtype = w_refs[0].dtype
    # Hoisted: cast covariates to the weight dtype once, reused by every layer.
    cat_w = cat_ref[...].astype(w_dtype)
    h = x_ref[...]
    for l in range(n_layers):
        wx_ref = w_refs[3 * l]
        wc_ref = w_refs[3 * l + 1]
        b_ref = w_refs[3 * l + 2]
        y = jnp.dot(h.astype(w_dtype), wx_ref[...],
                    preferred_element_type=jnp.float32)
        y = y + jnp.dot(cat_w, wc_ref[...], preferred_element_type=jnp.float32)
        y = y + b_ref[...]
        h = jnp.maximum(y, 0.0)              # ReLU (Dropout = identity in eval mode)
    o_ref[...] = h.astype(o_ref.dtype)


# ----------------------------------------------------------------------------
# One-time host-side parameter preparation (eval-mode inference):
# fold BN, split covariate columns, transpose, pad output dims to the lane width.
# bf16 weights by default (MXU-native on v6e/v7x); pass jnp.float32 for exactness.
# ----------------------------------------------------------------------------
def prepare_fclayers_params(params, n_cat, eps=1e-3, weights_dtype=jnp.bfloat16):
    prepared = []
    prev_out_pad = None
    for li, p in enumerate(params):
        scale = p["gamma"] / jnp.sqrt(p["var"] + eps)          # (d_out,)
        shift = p["beta"] - p["mean"] * scale
        W = p["W"] * scale[:, None]                            # (d_out, d_in + n_cat)
        b = p["b"] * scale + shift                             # (d_out,)
        d_out, fan_in = W.shape
        d_in = fan_in - n_cat
        # Layer 0 consumes the raw (unpadded) input width; deeper layers consume the
        # previous layer's lane-padded width (padded activation cols are exactly 0).
        k_in = d_in if li == 0 else prev_out_pad
        d_out_pad = _round_up(d_out, LANE)
        Wx = (jnp.zeros((k_in, d_out_pad), weights_dtype)
              .at[:d_in, :d_out].set(W[:, :d_in].T.astype(weights_dtype)))
        Wc = (jnp.zeros((n_cat, d_out_pad), weights_dtype)
              .at[:, :d_out].set(W[:, d_in:].T.astype(weights_dtype)))
        bp = jnp.zeros((1, d_out_pad), jnp.float32).at[0, :d_out].set(b)
        prepared.append((Wx, Wc, bp))
        prev_out_pad = d_out_pad
    return prepared


# ----------------------------------------------------------------------------
# FCLayers.forward equivalent (eval mode), single fused pallas_call.
# ----------------------------------------------------------------------------
def fclayers_forward(prepared, x, cat_tensor, n_out, *, tm=512):
    n_layers = len(prepared)
    B, d_in = x.shape
    n_cat = cat_tensor.shape[-1]
    assert prepared[0][0].shape[0] == d_in
    assert prepared[0][1].shape[0] == n_cat
    d_out_pad = prepared[-1][0].shape[1]

    # --- batch tile selection -------------------------------------------------
    B_sub = _round_up(B, SUBLANE)
    if B_sub >= 2 * SUBLANE:
        # keep >= 2 grid steps so ("parallel",) can shard the batch across the two
        # v7x TensorCores (harmless on single-TC v5e/v6e).
        tm = min(tm, _round_up((B_sub + 1) // 2, SUBLANE))
    else:
        tm = min(tm, B_sub)

    # --- per-generation VMEM budget --------------------------------------------
    try:
        vmem_cap = pltpu.get_tpu_info().vmem_capacity_bytes
    except Exception:
        vmem_cap = 64 << 20                        # conservative (v7x per-core VMEM)
    budget = min(int(vmem_cap * 0.8), 100 << 20)   # ~100 MiB v5e/v6e, ~51 MiB v7x

    weight_bytes = sum(wx.size * wx.dtype.itemsize
                       + wc.size * wc.dtype.itemsize
                       + bp.size * bp.dtype.itemsize
                       for wx, wc, bp in prepared)
    widest = max(d_in, n_cat, max(wx.shape[1] for wx, _, _ in prepared))

    def vmem_estimate(tile_m):
        io = 2 * 4 * tile_m * (d_in + n_cat + d_out_pad)   # double-buffered x/cat/out
        work = 3 * 4 * tile_m * widest                      # in-kernel activation slabs
        return weight_bytes + io + work + (2 << 20)

    while tm > SUBLANE and vmem_estimate(tm) > budget:
        tm = max(SUBLANE, _round_up(tm // 2, SUBLANE))

    B_pad = _round_up(B, tm)
    # Pad only the batch axis; feature dims stay unpadded (no one-hot DMA blowup).
    if B_pad != B:
        x = jnp.pad(x, ((0, B_pad - B), (0, 0)))
        cat_tensor = jnp.pad(cat_tensor, ((0, B_pad - B), (0, 0)))

    in_specs = [
        pl.BlockSpec((tm, d_in), lambda i: (i, 0)),      # activations: tiled on batch
        pl.BlockSpec((tm, n_cat), lambda i: (i, 0)),     # covariates: tiled on batch
    ]
    weight_args = []
    flops = 0
    bytes_accessed = (B_pad * (d_in + n_cat) + B_pad * d_out_pad) * 4 + weight_bytes
    for wx, wc, bp in prepared:
        weight_args += [wx, wc, bp]
        # Whole-array, single-copy resident in VMEM (not pipelined -> no 2x buffers).
        in_specs += [pl.BlockSpec(memory_space=pltpu.MemorySpace.VMEM)] * 3
        flops += 2 * B_pad * (wx.shape[0] + wc.shape[0]) * wx.shape[1]

    out_p = pl.pallas_call(
        functools.partial(_fused_fclayers_kernel, n_layers),
        out_shape=jax.ShapeDtypeStruct((B_pad, d_out_pad), jnp.float32),
        grid=(B_pad // tm,),
        in_specs=in_specs,
        out_specs=pl.BlockSpec((tm, d_out_pad), lambda i: (i, 0)),
        compiler_params=pltpu.CompilerParams(
            dimension_semantics=("parallel",),
            vmem_limit_bytes=budget),
        cost_estimate=pl.CostEstimate(
            flops=flops, transcendentals=0, bytes_accessed=bytes_accessed),
    )(x, cat_tensor, *weight_args)

    return out_p[:B, :n_out]


# ----------------------------------------------------------------------------
# Parameter construction (deterministic, mimics nn.Linear / BatchNorm1d shapes)
# ----------------------------------------------------------------------------
def init_fclayers_params(key, n_in, n_out, n_cat, n_layers, n_hidden):
    layers_dim = [n_in] + (n_layers - 1) * [n_hidden] + [n_out]
    params = []
    for d_in, d_out in zip(layers_dim[:-1], layers_dim[1:]):
        key, kw, kb, kg, kbt, km, kv = jax.random.split(key, 7)
        fan_in = d_in + n_cat   # inject_covariates=True -> covariates in every layer
        bound = 1.0 / float(fan_in) ** 0.5
        W = jax.random.uniform(kw, (d_out, fan_in), jnp.float32, -bound, bound)
        b = jax.random.uniform(kb, (d_out,), jnp.float32, -bound, bound)
        gamma = 1.0 + 0.1 * jax.random.normal(kg, (d_out,), jnp.float32)
        beta = 0.1 * jax.random.normal(kbt, (d_out,), jnp.float32)
        run_mean = 0.1 * jax.random.normal(km, (d_out,), jnp.float32)
        run_var = 1.0 + 0.1 * jax.random.uniform(kv, (d_out,), jnp.float32)
        params.append(
            dict(W=W, b=b, gamma=gamma, beta=beta, mean=run_mean, var=run_var))
    return params


def fclayers_reference(params, x, cat_tensor, eps=1e-3):
    """Plain-JAX reference (unfused, unpadded) for correctness checking."""
    for p in params:
        x_cat = jnp.concatenate([x, cat_tensor], axis=-1)
        y = x_cat @ p["W"].T + p["b"]
        y = (y - p["mean"]) / jnp.sqrt(p["var"] + eps) * p["gamma"] + p["beta"]
        x = jnp.maximum(y, 0.0)
    return x


if __name__ == "__main__":
    # Module hyperparameters (small, consistent with FCLayers defaults scaled down)
    n_in, n_out, n_cat = 32, 16, 4
    n_layers, n_hidden = 2, 64

    key = jax.random.PRNGKey(0)
    key, kp = jax.random.split(key)
    params = init_fclayers_params(kp, n_in, n_out, n_cat, n_layers, n_hidden)

    # Default path: bf16 weights (MXU-native on v6e/v7x), f32 accumulation.
    prepared_bf16 = prepare_fclayers_params(params, n_cat)
    # Exactness path: f32 weights for a tight check against the reference.
    prepared_f32 = prepare_fclayers_params(params, n_cat, weights_dtype=jnp.float32)

    fwd = jax.jit(lambda prep, xx, cc: fclayers_forward(prep, xx, cc, n_out))

    # --- test 1: small batch, bf16 weights, single-tile grid -----------------
    batch = 8
    key, kx, kc = jax.random.split(key, 3)
    x = jax.random.normal(kx, (batch, n_in), dtype=jnp.float32)
    cat_idx = jax.random.randint(kc, (batch,), 0, n_cat)
    cat_tensor = jax.nn.one_hot(cat_idx, n_cat, dtype=jnp.float32)
    out = jax.block_until_ready(fwd(prepared_bf16, x, cat_tensor))
    ref = fclayers_reference(params, x, cat_tensor)
    assert out.shape == (batch, n_out), out.shape
    assert jnp.allclose(out, ref, atol=5e-2, rtol=5e-2), "bf16 path mismatch"

    # --- test 2: batch not a tile multiple, f32 weights, multi-tile grid ------
    batch = 24
    key, kx, kc = jax.random.split(key, 3)
    x = jax.random.normal(kx, (batch, n_in), dtype=jnp.float32)
    cat_idx = jax.random.randint(kc, (batch,), 0, n_cat)
    cat_tensor = jax.nn.one_hot(cat_idx, n_cat, dtype=jnp.float32)
    out = jax.block_until_ready(fwd(prepared_f32, x, cat_tensor))
    ref = fclayers_reference(params, x, cat_tensor)
    assert out.shape == (batch, n_out), out.shape
    assert jnp.allclose(out, ref, atol=1e-4, rtol=1e-4), "f32 path mismatch"

    print("KERNEL_OK")
</pallas_src>

<mosaic_0001>
module attributes {stable_mosaic.version = 11 : i64} {
  func.func @_fused_fclayers_kernel(%arg0: i32, %arg1: memref<8x32xf32, #tpu.memory_space<vmem>>, %arg2: memref<8x4xf32, #tpu.memory_space<vmem>>, %arg3: memref<32x128xbf16, #tpu.memory_space<vmem>>, %arg4: memref<4x128xbf16, #tpu.memory_space<vmem>>, %arg5: memref<1x128xf32, #tpu.memory_space<vmem>>, %arg6: memref<128x128xbf16, #tpu.memory_space<vmem>>, %arg7: memref<4x128xbf16, #tpu.memory_space<vmem>>, %arg8: memref<1x128xf32, #tpu.memory_space<vmem>>, %arg9: memref<8x128xf32, #tpu.memory_space<vmem>>) attributes {dimension_semantics = [#tpu.dimension_semantics<parallel>], iteration_bounds = array<i64: 1>, scalar_prefetch = 0 : i64, scratch_operands = 0 : i64, tpu.core_type = #tpu.core_type<tc>, window_params = [{transform_indices = @transform_0, window_bounds = array<i64: 8, 32>}, {transform_indices = @transform_1, window_bounds = array<i64: 8, 4>}, {pipeline_mode = #tpu.pipeline_mode<synchronous>, transform_indices = @transform_2, window_bounds = array<i64: 32, 128>}, {pipeline_mode = #tpu.pipeline_mode<synchronous>, transform_indices = @transform_3, window_bounds = array<i64: 4, 128>}, {pipeline_mode = #tpu.pipeline_mode<synchronous>, transform_indices = @transform_4, window_bounds = array<i64: 1, 128>}, {pipeline_mode = #tpu.pipeline_mode<synchronous>, transform_indices = @transform_5, window_bounds = array<i64: 128, 128>}, {pipeline_mode = #tpu.pipeline_mode<synchronous>, transform_indices = @transform_6, window_bounds = array<i64: 4, 128>}, {pipeline_mode = #tpu.pipeline_mode<synchronous>, transform_indices = @transform_7, window_bounds = array<i64: 1, 128>}, {transform_indices = @transform_8, window_bounds = array<i64: 8, 128>}]} {
    %c0 = arith.constant 0 : index
    %c0_0 = arith.constant 0 : index
    %0 = vector.load %arg2[%c0, %c0_0] : memref<8x4xf32, #tpu.memory_space<vmem>>, vector<8x4xf32>
    %1 = arith.truncf %0 : vector<8x4xf32> to vector<8x4xbf16>
    %c0_1 = arith.constant 0 : index
    %c0_2 = arith.constant 0 : index
    %2 = vector.load %arg1[%c0_1, %c0_2] : memref<8x32xf32, #tpu.memory_space<vmem>>, vector<8x32xf32>
    %3 = arith.truncf %2 : vector<8x32xf32> to vector<8x32xbf16>
    %c0_3 = arith.constant 0 : index
    %c0_4 = arith.constant 0 : index
    %4 = vector.load %arg3[%c0_3, %c0_4] : memref<32x128xbf16, #tpu.memory_space<vmem>>, vector<32x128xbf16>
    %cst = arith.constant dense<0.000000e+00> : vector<8x128xf32>
    %5 = tpu.matmul %3, %4, %cst {dimension_numbers = #tpu.dot_dimension_numbers<[1], [0], [0], [1], [0, 0, 1, 1], [], []>} : vector<8x32xbf16>, vector<32x128xbf16>, vector<8x128xf32> -> vector<8x128xf32>
    %c0_5 = arith.constant 0 : index
    %c0_6 = arith.constant 0 : index
    %6 = vector.load %arg4[%c0_5, %c0_6] : memref<4x128xbf16, #tpu.memory_space<vmem>>, vector<4x128xbf16>
    %cst_7 = arith.constant dense<0.000000e+00> : vector<8x128xf32>
    %7 = tpu.matmul %1, %6, %cst_7 {dimension_numbers = #tpu.dot_dimension_numbers<[1], [0], [0], [1], [0, 0, 1, 1], [], []>} : vector<8x4xbf16>, vector<4x128xbf16>, vector<8x128xf32> -> vector<8x128xf32>
    %8 = arith.addf %5, %7 : vector<8x128xf32>
    %c0_8 = arith.constant 0 : index
    %c0_9 = arith.constant 0 : index
    %9 = vector.load %arg5[%c0_8, %c0_9] : memref<1x128xf32, #tpu.memory_space<vmem>>, vector<1x128xf32>
    %10 = vector.broadcast %9 : vector<1x128xf32> to vector<8x128xf32>
    %11 = arith.addf %8, %10 : vector<8x128xf32>
    %cst_10 = arith.constant 0.000000e+00 : f32
    %12 = vector.broadcast %cst_10 : f32 to vector<8x128xf32>
    %13 = arith.maximumf %11, %12 : vector<8x128xf32>
    %14 = arith.truncf %13 : vector<8x128xf32> to vector<8x128xbf16>
    %c0_11 = arith.constant 0 : index
    %c0_12 = arith.constant 0 : index
    %15 = vector.load %arg6[%c0_11, %c0_12] : memref<128x128xbf16, #tpu.memory_space<vmem>>, vector<128x128xbf16>
    %cst_13 = arith.constant dense<0.000000e+00> : vector<8x128xf32>
    %16 = tpu.matmul %14, %15, %cst_13 {dimension_numbers = #tpu.dot_dimension_numbers<[1], [0], [0], [1], [0, 0, 1, 1], [], []>} : vector<8x128xbf16>, vector<128x128xbf16>, vector<8x128xf32> -> vector<8x128xf32>
    %c0_14 = arith.constant 0 : index
    %c0_15 = arith.constant 0 : index
    %17 = vector.load %arg7[%c0_14, %c0_15] : memref<4x128xbf16, #tpu.memory_space<vmem>>, vector<4x128xbf16>
    %cst_16 = arith.constant dense<0.000000e+00> : vector<8x128xf32>
    %18 = tpu.matmul %1, %17, %cst_16 {dimension_numbers = #tpu.dot_dimension_numbers<[1], [0], [0], [1], [0, 0, 1, 1], [], []>} : vector<8x4xbf16>, vector<4x128xbf16>, vector<8x128xf32> -> vector<8x128xf32>
    %19 = arith.addf %16, %18 : vector<8x128xf32>
    %c0_17 = arith.constant 0 : index
    %c0_18 = arith.constant 0 : index
    %20 = vector.load %arg8[%c0_17, %c0_18] : memref<1x128xf32, #tpu.memory_space<vmem>>, vector<1x128xf32>
    %21 = vector.broadcast %20 : vector<1x128xf32> to vector<8x128xf32>
    %22 = arith.addf %19, %21 : vector<8x128xf32>
    %cst_19 = arith.constant 0.000000e+00 : f32
    %23 = vector.broadcast %cst_19 : f32 to vector<8x128xf32>
    %24 = arith.maximumf %22, %23 : vector<8x128xf32>
    %c0_20 = arith.constant 0 : index
    %c0_21 = arith.constant 0 : index
    %25 = vector.load %arg9[%c0_20, %c0_21] : memref<8x128xf32, #tpu.memory_space<vmem>>, vector<8x128xf32>
    tpu.vector_store %arg9[%c0_20, %c0_21], %24 {strides = array<i32>} : memref<8x128xf32, #tpu.memory_space<vmem>>, vector<8x128xf32>,
    return
  }
  func.func @transform_0(%arg0: i32) -> (i32, i32) {
    %c0_i32 = arith.constant 0 : i32
    %c0_i32_0 = arith.constant 0 : i32
    return %arg0, %c0_i32 : i32, i32
  }
  func.func @transform_1(%arg0: i32) -> (i32, i32) {
    %c0_i32 = arith.constant 0 : i32
    %c0_i32_0 = arith.constant 0 : i32
    return %arg0, %c0_i32 : i32, i32
  }
  func.func @transform_2(%arg0: i32) -> (i32, i32) {
    %c0_i32 = arith.constant 0 : i32
    %c0_i32_0 = arith.constant 0 : i32
    %c0_i32_1 = arith.constant 0 : i32
    return %c0_i32, %c0_i32_0 : i32, i32
  }
  func.func @transform_3(%arg0: i32) -> (i32, i32) {
    %c0_i32 = arith.constant 0 : i32
    %c0_i32_0 = arith.constant 0 : i32
    %c0_i32_1 = arith.constant 0 : i32
    return %c0_i32, %c0_i32_0 : i32, i32
  }
  func.func @transform_4(%arg0: i32) -> (i32, i32) {
    %c0_i32 = arith.constant 0 : i32
    %c0_i32_0 = arith.constant 0 : i32
    %c0_i32_1 = arith.constant 0 : i32
    return %c0_i32, %c0_i32_0 : i32, i32
  }
  func.func @transform_5(%arg0: i32) -> (i32, i32) {
    %c0_i32 = arith.constant 0 : i32
    %c0_i32_0 = arith.constant 0 : i32
    %c0_i32_1 = arith.constant 0 : i32
    return %c0_i32, %c0_i32_0 : i32, i32
  }
  func.func @transform_6(%arg0: i32) -> (i32, i32) {
    %c0_i32 = arith.constant 0 : i32
    %c0_i32_0 = arith.constant 0 : i32
    %c0_i32_1 = arith.constant 0 : i32
    return %c0_i32, %c0_i32_0 : i32, i32
  }
  func.func @transform_7(%arg0: i32) -> (i32, i32) {
    %c0_i32 = arith.constant 0 : i32
    %c0_i32_0 = arith.constant 0 : i32
    %c0_i32_1 = arith.constant 0 : i32
    return %c0_i32, %c0_i32_0 : i32, i32
  }
  func.func @transform_8(%arg0: i32) -> (i32, i32) {
    %c0_i32 = arith.constant 0 : i32
    %c0_i32_0 = arith.constant 0 : i32
    return %arg0, %c0_i32 : i32, i32
  }
}

</mosaic_0001>

<bundles_post_ra>
// kernel: _lambda_.1
= control target key start
LH: loop header
LB: loop body
LE: loop exit
PB: predicated region body
PF: predicated region fallthrough
CT: control target
= control target key end

     0   :  { %13 = vsyncpa [#allocation3], 0  ;;  %s630_s0 = inlined_call_operand.vmem [shape: f32[8,32], index: 0, kind: input, shape index: {}]   ;;  %s631_s1 = inlined_call_operand.vmem [shape: f32[8,4], index: 1, kind: input, shape index: {}]   ;;  %s632_s2 = inlined_call_operand.hbm [shape: bf16[32,128], index: 2, kind: input, shape index: {}]   ;;  %s633_s3 = inlined_call_operand.vmem [shape: bf16[4,128], index: 3, kind: input, shape index: {}]   ;;  %s634_s4 = inlined_call_operand.vmem [shape: f32[1,128], index: 4, kind: input, shape index: {}]   ;;  %s635_s5 = inlined_call_operand.hbm [shape: bf16[128,128], index: 5, kind: input, shape index: {}]   ;;  %s636_s6 = inlined_call_operand.vmem [shape: bf16[4,128], index: 6, kind: input, shape index: {}]   ;;  %s637_s7 = inlined_call_operand.vmem [shape: f32[1,128], index: 7, kind: input, shape index: {}]   ;;  %s638_s8 = inlined_call_operand.hbm [shape: f32[8,128], index: 8, kind: output, shape index: {}]  }
   0x1   :  { %14 = vsyncpa [#allocation6], 0 }
   0x2   :  { %15 = vsyncpa [#allocation4], 0  ;;  %s516_s27 = smov [#allocation2]   ;;  %s444_s9 = scalar_lea.hbm %s632_s2, 256 }
   0x3   :  { %s25_s28 = sshll.u32 %s516_s27, 4  ;;  %p445_p0 = scmp.ne.s32.totalorder %s632_s2, %s444_s9  ;;  %s26_s28 = int_to_ptr.vmem [resolvable:$true] %s25_s28 }
   0x4   :  { %p448_p1 = scmp.lt.u32.totalorder %s444_s9, %s632_s2 }
   0x6   :  { %p450_p2 = pnand %p448_p1, %p445_p0 }
   0x8   :  { %453 = shalt.err (!%p450_p2)
}
   0x9   :  { %s454_s14 = scalar_lea.vmem %s26_s28, 256  ;;  %p459_p4 = scmp.lt.s32.totalorder %s26_s28, %s26_s28 }
   0xa   :  { %p455_p3 = scmp.ne.s32.totalorder %s26_s28, %s454_s14  ;;  %p460_p5 = scmp.lt.s32.totalorder %s454_s14, %s454_s14 }
   0xc   :  { %p461_p6 = por %p460_p5, %p459_p4 }
   0xe   :  { %p462_p7 = pnand %p461_p6, %p455_p3 }
  0x10   :  { %465 = shalt.err (!%p462_p7)
}
  0x11   :  { %s517_s15 = smov 64   ;;  %s518_s16 = smov 4  }
  0x12   :  { %31 = dma.hbm_to_vmem [thread:$0]  %s632_s2, 256, %s26_s28, [#allocation3], %s517_s15, %s517_s15, %s518_s16  }
  0x13   :  { %s519_s19 = smov [#allocation5]   ;;  %s466_s23 = scalar_lea.hbm %s635_s5, 1024 }
  0x14   :  { %s41_s20 = sshll.u32 %s519_s19, 4  ;;  %p467_p8 = scmp.ne.s32.totalorder %s635_s5, %s466_s23  ;;  %s42_s20 = int_to_ptr.vmem [resolvable:$true] %s41_s20 }
  0x15   :  { %p470_p9 = scmp.lt.u32.totalorder %s466_s23, %s635_s5 }
  0x17   :  { %p472_p10 = pnand %p470_p9, %p467_p8 }
  0x19   :  { %475 = shalt.err (!%p472_p10)
}
  0x1a   :  { %s476_s29 = scalar_lea.vmem %s42_s20, 1024  ;;  %p481_p12 = scmp.lt.s32.totalorder %s42_s20, %s42_s20 }
  0x1b   :  { %p477_p11 = scmp.ne.s32.totalorder %s42_s20, %s476_s29  ;;  %p482_p13 = scmp.lt.s32.totalorder %s476_s29, %s476_s29 }
  0x1d   :  { %p483_p0 = por %p482_p13, %p481_p12 }
  0x1f   :  { %p484_p1 = pnand %p483_p0, %p477_p11 }
  0x21   :  { %487 = shalt.err (!%p484_p1)
}
  0x22   :  { %47 = dma.hbm_to_vmem [thread:$0]  %s635_s5, 1024, %s42_s20, [#allocation6], %s517_s15, %s517_s15, %s518_s16  }
  0x23   :  { %510 = dma.done.wait [#allocation3], 256  }
  0x24   :  { %511 = vsyncadd [#allocation3], 4294967040 }
  0x25   :  { %512 = dma.done.wait [#allocation6], 1024  }
  0x26   :  { %513 = vsyncadd [#allocation6], 4294966272  ;;  %v520_v0 = vmov 0.0   ;;  %vm521_vm0 = vmmov 0   ;;  %vm72_vm1 = vcmask 1041408   ;;  %v59_v2 = vld [vmem:[%s631_s1] sm:$0xff] }
  0x27   :  { %387 = vmatprep.subr.bf16.mxu0 %v520_v0  ;;  %389 = vmatprep.mubr.msk.bf16.mxu0 %vm521_vm0, %v520_v0  ;;  %v67_v1 = vld [vmem:[%s633_s3] sm:$0x3]  ;;  %v60_v4 = vpack.c.bf16 %v59_v2, %v59_v2  ;;  %vm68_vm2 = vcmask 31744   ;;  %v436_v6 = vld [vmem:[#allocation5] sm:$0xff]   ;;  %v435_v7 = vld [vmem:[#allocation2 + $0x8] sm:$0xff]   ;;  %vm128_vm3 = vcmask 261120  }
  0x28   :  { %407 = vmatprep.subr.bf16.mxu1 %v520_v0  ;;  %423 = vmatprep.mubr.msk.bf16.mxu1 %vm521_vm0, %v520_v0  ;;  %v74_v3 = vsel %vm72_vm1, %v67_v1, 0  ;;  %v434_v5 = vld [vmem:[#allocation2] sm:$0xff]   ;;  %v437_v10 = vld [vmem:[#allocation5 + $0x8] sm:$0xff]   ;;  %v439_v14 = vld [vmem:[#allocation5 + $0x18] sm:$0xff]  }
  0x29   :  { %388 = vmatpush3.bf16.msra.mxu0 %v74_v3  ;;  %v198_v8 = vld [vmem:[%s636_s6] sm:$0x3]  ;;  %408 = vmatpush3.bf16.msra.mxu1 %v436_v6  ;;  %v440_v15 = vld [vmem:[#allocation5 + $0x20] sm:$0xff]   ;;  %v441_v16 = vld [vmem:[#allocation5 + $0x28] sm:$0xff]  }
  0x2a   :  { %393 = vmatprep.subr.bf16.mxu0 %v520_v0  ;;  %v61_v9 = vld [vmem:[%s630_s0] sm:$0xff]  ;;  %409 = vmatprep.subr.bf16.mxu1 %v520_v0  ;;  %v200_v12 = vsel %vm72_vm1, %v198_v8, 0  ;;  %v443_v18 = vld [vmem:[#allocation5 + $0x38] sm:$0xff]  }
  0x2b   :  { %v62_v11 = vpack.c.bf16 %v61_v9, %v61_v9  ;;  %v438_v13 = vld [vmem:[#allocation5 + $0x10] sm:$0xff]  }
  0x2c   :  { %390 = vmatmul.mubr.msk.bf16.vlgmr.msra.gmra.mrb[0].mxu0 %vm68_vm2, %v60_v4  ;;  %v442_v17 = vld [vmem:[#allocation5 + $0x30] sm:$0xff]  }
  0x2d   :  { %394 = vmatpush3.bf16.msra.mxu0 %v434_v5  ;;  %397 = vmatprep.mubr.msk.bf16.mxu0 %vm521_vm0, %v520_v0  ;;  %v360_v24 = vld [vmem:[%s634_s4] ss:$0 sm:$0xff]  ;;  %s522_s4 = smov [#allocation7]  }
  0x2e   :  { %395 = vmatprep.subr.bf16.mxu0 %v520_v0  ;;  %410 = vmatpush3.bf16.msra.mxu1 %v437_v10  ;;  %v370_v37 = vld [vmem:[%s637_s7] ss:$0 sm:$0xff]  ;;  %s346_s15 = sshll.u32 %s522_s4, 4  ;;  %s347_s15 = int_to_ptr.vmem [resolvable:$true] %s346_s15 }
  0x2f   :  { %411 = vmatprep.subr.bf16.mxu1 %v520_v0  ;;  %s488_s16 = scalar_lea.vmem %s347_s15, 128  ;;  %p493_p3 = scmp.lt.s32.totalorder %s347_s15, %s347_s15 }
  0x30   :  { %p489_p2 = scmp.ne.s32.totalorder %s347_s15, %s488_s16  ;;  %p494_p4 = scmp.lt.s32.totalorder %s488_s16, %s488_s16 }
  0x31   :  { %396 = vmatpush3.bf16.msra.mxu0 %v435_v7 }
  0x32   :  { %401 = vmatprep.subr.bf16.mxu0 %v520_v0  ;;  %412 = vmatpush3.bf16.msra.mxu1 %v438_v13  ;;  %p495_p5 = por %p494_p4, %p493_p3 }
  0x33   :  { %413 = vmatprep.subr.bf16.mxu1 %v520_v0 }
  0x34   :  { %398 = vmatmul.mubr.msk.bf16.vlgmr.msra.gmra.mrb[4].mxu0 %vm128_vm3, %v62_v11  ;;  %p496_p6 = pnand %p495_p5, %p489_p2 }
  0x35   :  { %402 = vmatpush3.bf16.msra.mxu0 %v200_v12  ;;  %403 = vmatprep.mubr.msk.bf16.mxu0 %vm521_vm0, %v520_v0 }
  0x36   :  { %414 = vmatpush3.bf16.msra.mxu1 %v439_v14 }
  0x37   :  { %415 = vmatprep.subr.bf16.mxu1 %v520_v0 }
  0x3a   :  { %416 = vmatpush3.bf16.msra.mxu1 %v440_v15 }
  0x3b   :  { %417 = vmatprep.subr.bf16.mxu1 %v520_v0 }
  0x3c   :  { %404 = vmatmul.mubr.msk.bf16.vlgmr.msra.gmra.mrb[8].mxu0 %vm68_vm2, %v60_v4 }
  0x3e   :  { %418 = vmatpush3.bf16.msra.mxu1 %v441_v16 }
  0x3f   :  { %419 = vmatprep.subr.bf16.mxu1 %v520_v0 }
  0x42   :  { %420 = vmatpush3.bf16.msra.mxu1 %v442_v17 }
  0x43   :  { %421 = vmatprep.subr.bf16.mxu1 %v520_v0 }
  0x46   :  { %422 = vmatpush3.bf16.msra.mxu1 %v443_v18 }
  0xff   :  { %v110_v19 = vpop.f32.mrb[0].mxu0 }
 0x100   :  { %v391_v20 = vpop.f32.mrb[1].mxu0 }
 0x101   :  { %v113_v21 = vpop.f32.mrb[2].mxu0 }
 0x102   :  { %v392_v22 = vpop.f32.mrb[3].mxu0 }
 0x107   :  { %v166_v23 = vpop.f32.mrb[4].mxu0 }
 0x108   :  { %v167_v25 = vadd.f32 %v166_v23, %v110_v19  ;;  %v399_v26 = vpop.f32.mrb[5].mxu0 }
 0x109   :  { %v169_v27 = vpop.f32.mrb[6].mxu0 }
 0x10a   :  { %v179_v28 = vadd.f32 %v360_v24, %v167_v25  ;;  %v400_v29 = vpop.f32.mrb[7].mxu0 }
 0x10c   :  { %v180_v30 = vmax.f32 %v179_v28, 0.0 }
 0x10e   :  { %v181_v31 = vpack.c.bf16 %v180_v30, %v180_v30 }
 0x10f   :  { %v236_v32 = vpop.f32.mrb[8].mxu0 }
 0x110   :  { %424 = vmatmul.mubr.bf16.vlgmr.msra.gmra.mrb[0].mxu1 %v181_v31  ;;  %v405_v33 = vpop.f32.mrb[9].mxu0 }
 0x111   :  { %v239_v34 = vpop.f32.mrb[10].mxu0 }
 0x112   :  { %v406_v35 = vpop.f32.mrb[11].mxu0 }
 0x1e3   :  { %v324_v36 = vpop.f32.mrb[0].mxu1 }
 0x1e4   :  { %v325_v38 = vadd.f32 %v324_v36, %v236_v32  ;;  %v425_v39 = vpop.f32.mrb[1].mxu1 }
 0x1e5   :  { %v327_v40 = vpop.f32.mrb[2].mxu1 }
 0x1e6   :  { %v337_v41 = vadd.f32 %v370_v37, %v325_v38  ;;  %v426_v42 = vpop.f32.mrb[3].mxu1 }
 0x1e8   :  { %v338_v43 = vmax.f32 %v337_v41, 0.0 }
 0x1ea   :  { %339 = vst [vmem:[#allocation7] sm:$0xff] %v338_v43 }
 0x1eb   :  { %499 = shalt.err (!%p496_p6)
}
 0x1ec   :  { %s500_s7 = scalar_lea.hbm %s638_s8, 128 }
 0x1ed   :  { %p501_p7 = scmp.ne.s32.totalorder %s638_s8, %s500_s7  ;;  %p504_p8 = scmp.lt.u32.totalorder %s500_s7, %s638_s8 }
 0x1ef   :  { %p506_p9 = pnand %p504_p8, %p501_p7 }
 0x1f1   :  { %509 = shalt.err (!%p506_p9)
}
 0x1f2   :  { %349 = dma.vmem_to_hbm [thread:$0]  %s347_s15, 128, %s638_s8, [#allocation4]  }
 0x1f3   :  { %514 = dma.done.wait [#allocation4], 128  }
 0x1f4   :  { %515 = vsyncadd [#allocation4], 4294967168 }
 0x1f5   :  { %353 = vsyncpa [#allocation3], 1 }
 0x1f6   :  { %354 = vsyncpa [#allocation6], 1 }
 0x1f7   :  { %355 = vsyncpa [#allocation4], 1 }

</bundles_post_ra>
